<compile_context>
chip_gen: v6e
topology: v6e:2x2x1
jax: 0.10.0
libtpu: 0.0.40
codegen_flags: <defaults>
</compile_context>

<pallas_src>
import functools
import math

import jax
import jax.numpy as jnp
import numpy as np
from jax.experimental import pallas as pl
from jax.experimental.pallas import tpu as pltpu


def _round_up(x, m):
    return (x + m - 1) // m * m


# ----------------------------------------------------------------------------
# Kernel
# ----------------------------------------------------------------------------
def _mpnn_kernel(eidx_ref, dst_row_ref, x_ref, out_ref, acc_ref, cnt_ref, *,
                 aggr, residual):
    e = pl.program_id(1)
    n_e = pl.num_programs(1)

    @pl.when(e == 0)
    def _init():
        acc_ref[...] = jnp.zeros_like(acc_ref)
        cnt_ref[...] = jnp.zeros_like(cnt_ref)

    x = x_ref[...]                                   # [Np, TF] f32 (resident)
    eidx = eidx_ref[...]                             # [TE, 2]  i32
    src_col = eidx[:, 0:1]                           # [TE, 1]
    dst_col = eidx[:, 1:2]                           # [TE, 1]
    dst_row = dst_row_ref[...]                       # [1, TE]  (lane-dense)

    te = eidx.shape[0]
    np_ = x.shape[0]

    # Merged gather one-hot: message m_ij = x_src + x_dst, so
    #   msgs = (onehot_src + onehot_dst) @ x    -> a single MXU pass.
    # NOTE: one-hots kept fp32 (not bf16) so the gather/scatter stay exact
    # vs. the fp32 reference within 1e-5; padded edges use id == -1 and drop out.
    ids_g = jax.lax.broadcasted_iota(jnp.int32, (te, np_), 1)
    g_oh = ((ids_g == src_col).astype(jnp.float32) +
            (ids_g == dst_col).astype(jnp.float32))                 # [TE, Np]
    msgs = jnp.dot(g_oh, x, preferred_element_type=jnp.float32)     # [TE, TF]

    # Scatter one-hot built directly in [Np, TE] orientation -> plain matmul.
    ids_s = jax.lax.broadcasted_iota(jnp.int32, (np_, te), 0)
    s_oh = (ids_s == dst_row).astype(jnp.float32)                   # [Np, TE]
    acc_ref[...] += jnp.dot(s_oh, msgs, preferred_element_type=jnp.float32)

    if aggr == 'mean':
        # in-degree counts (per edge tile), accumulated across tiles
        cnt_ref[...] += jnp.sum(s_oh, axis=1, keepdims=True)        # [Np, 1]

    @pl.when(e == n_e - 1)
    def _finalize():
        agg = acc_ref[...]
        if aggr == 'mean':
            agg = agg / jnp.maximum(cnt_ref[...], 1.0)   # clamp(min=1)
        # TODO(synk): BatchNorm1d / Dropout branches of update() are identity
        # here (use_batchnorm=False, dropout_prob=0.0) and are not emitted.
        if residual:
            # reference guards on shape equality; in/out dims match here
            agg = agg + x
        out_ref[...] = agg.astype(out_ref.dtype)


# ----------------------------------------------------------------------------
# Tile sizing / VMEM budgeting
# ----------------------------------------------------------------------------
def _choose_edge_tile(n_pad, tf, e_hint, budget=36 << 20):
    """Largest edge tile (multiple of 128) whose working set fits `budget`."""
    # resident: x blk (2-buf) + out blk (2-buf) + acc + counts (lane-padded)
    fixed = 4 * (4 * n_pad * tf + n_pad * tf + n_pad * 128)
    # per edge row: padded index blocks (2-buf) + one-hot / msgs temporaries
    per_row = 4 * (2 * 128 + 2 * 8 + 3 * n_pad + tf)
    avail = max(budget - fixed, per_row * 128)
    te = (avail // per_row) // 128 * 128
    te = int(max(128, min(te, 2048)))
    te = min(te, _round_up(max(e_hint, 1), 128))
    return int(te)


def _vmem_limit_bytes(n_pad, tf, te):
    est = 4 * (4 * n_pad * tf + n_pad * tf + n_pad * 128)
    est += 4 * te * (2 * 128 + 2 * 8 + 3 * n_pad + tf)
    # 2x headroom for compiler temporaries; clamp to [32 MiB, 48 MiB] so the
    # limit is raised above the scoped default yet fits v7x's 64 MiB physical.
    return int(min(max(2 * est, 32 << 20), 48 << 20))


# ----------------------------------------------------------------------------
# Wrapper
# ----------------------------------------------------------------------------
def tensor_message_passing(node_features, edge_index, *, aggr='sum',
                           residual=True):
    """node_features: [N, F] float32; edge_index: [2, E] int (PyTorch layout)."""
    N, F = node_features.shape
    E = edge_index.shape[1]

    n_pad = _round_up(N, 128)            # full MXU lanes for gather one-hot
    f_pad = _round_up(F, 128)            # lane-dense output stores
    tf = math.gcd(f_pad, 512)            # feature tile (multiple of 128)
    te = _choose_edge_tile(n_pad, tf, E)
    e_pad = _round_up(max(E, 1), te)
    n_e_tiles = e_pad // te
    n_f_tiles = f_pad // tf

    # Pad node features with zero rows/cols (sliced off at the end).
    x_p = jnp.zeros((n_pad, f_pad), node_features.dtype)
    x_p = x_p.at[:N, :F].set(node_features)

    # Edge indices: column layout for the gather one-hot, lane-dense row layout
    # for the scatter one-hot. Padded edges get id -1 -> all-zero one-hot rows.
    eidx = edge_index.astype(jnp.int32)
    eidx_col = jnp.full((e_pad, 2), -1, jnp.int32)
    eidx_col = eidx_col.at[:E, 0].set(eidx[0]).at[:E, 1].set(eidx[1])
    dst_row = jnp.full((1, e_pad), -1, jnp.int32).at[0, :E].set(eidx[1])

    kernel = functools.partial(_mpnn_kernel, aggr=aggr, residual=residual)

    out = pl.pallas_call(
        kernel,
        out_shape=jax.ShapeDtypeStruct((n_pad, f_pad), node_features.dtype),
        grid_spec=pltpu.PrefetchScalarGridSpec(
            num_scalar_prefetch=0,
            grid=(n_f_tiles, n_e_tiles),
            in_specs=[
                pl.BlockSpec((te, 2), lambda f, e: (e, 0)),       # edge ids (cols)
                pl.BlockSpec((1, te), lambda f, e: (0, e)),       # dst ids (row)
                pl.BlockSpec((n_pad, tf), lambda f, e: (0, f)),   # node features
            ],
            out_specs=pl.BlockSpec((n_pad, tf), lambda f, e: (0, f)),
            scratch_shapes=[
                pltpu.VMEM((n_pad, tf), jnp.float32),   # accumulator
                pltpu.VMEM((n_pad, 1), jnp.float32),    # in-degree counts
            ],
        ),
        compiler_params=pltpu.CompilerParams(
            dimension_semantics=("parallel", "arbitrary"),
            vmem_limit_bytes=_vmem_limit_bytes(n_pad, tf, te),
        ),
    )(eidx_col, dst_row, x_p)

    return out[:N, :F]


# ----------------------------------------------------------------------------
# Pure-JAX reference (matches the PyTorch base-class forward)
# ----------------------------------------------------------------------------
def _reference(node_features, edge_index, *, aggr='sum', residual=True):
    N = node_features.shape[0]
    src = node_features[edge_index[0]]
    dst = node_features[edge_index[1]]
    msgs = src + dst                                   # message()
    agg = jnp.zeros_like(node_features).at[edge_index[1]].add(msgs)
    if aggr == 'mean':
        counts = jnp.zeros((N,), node_features.dtype).at[edge_index[1]].add(1.0)
        agg = agg / jnp.maximum(counts, 1.0)[:, None]
    out = agg
    if residual and node_features.shape == out.shape:
        out = node_features + out
    return out


if __name__ == "__main__":
    key = jax.random.PRNGKey(0)
    k_x, k_e = jax.random.split(key)

    N, F, E = 16, 32, 64   # small graph: 16 nodes, 32-dim features, 64 edges
    node_features = jax.random.normal(k_x, (N, F), dtype=jnp.float32)
    edge_index = jax.random.randint(k_e, (2, E), 0, N, dtype=jnp.int32)

    ok = True
    for aggr in ("sum", "mean"):
        out = tensor_message_passing(node_features, edge_index,
                                     aggr=aggr, residual=True)
        out = jax.block_until_ready(out)
        ref = _reference(node_features, edge_index, aggr=aggr, residual=True)
        ok &= bool(np.allclose(np.asarray(out), np.asarray(ref),
                               rtol=1e-5, atol=1e-5))

    if ok:
        print("KERNEL_OK")
    else:
        print("KERNEL_MISMATCH")
</pallas_src>

<mosaic_0001>
module attributes {stable_mosaic.version = 11 : i64} {
  func.func @_mpnn_kernel(%arg0: i32, %arg1: i32, %arg2: memref<128x2xi32, #tpu.memory_space<vmem>>, %arg3: memref<1x128xi32, #tpu.memory_space<vmem>>, %arg4: memref<128x128xf32, #tpu.memory_space<vmem>>, %arg5: memref<128x128xf32, #tpu.memory_space<vmem>>, %arg6: memref<128x128xf32, #tpu.memory_space<vmem>>, %arg7: memref<128x1xf32, #tpu.memory_space<vmem>>) attributes {dimension_semantics = [#tpu.dimension_semantics<parallel>, #tpu.dimension_semantics<arbitrary>], iteration_bounds = array<i64: 1, 1>, scalar_prefetch = 0 : i64, scratch_operands = 2 : i64, tpu.core_type = #tpu.core_type<tc>, window_params = [{transform_indices = @transform_0, window_bounds = array<i64: 128, 2>}, {transform_indices = @transform_1, window_bounds = array<i64: 1, 128>}, {transform_indices = @transform_2, window_bounds = array<i64: 128, 128>}, {transform_indices = @transform_3, window_bounds = array<i64: 128, 128>}]} {
    %c0_i32 = arith.constant 0 : i32
    %0 = arith.cmpi eq, %arg1, %c0_i32 : i32
    %1 = arith.extui %0 : i1 to i32
    %c0_i32_0 = arith.constant 0 : i32
    %2 = arith.cmpi ne, %1, %c0_i32_0 : i32
    scf.if %2 {
      %cst_13 = arith.constant 0.000000e+00 : f32
      %31 = vector.broadcast %cst_13 : f32 to vector<128x128xf32>
      %c0_14 = arith.constant 0 : index
      %c0_15 = arith.constant 0 : index
      %32 = vector.load %arg6[%c0_14, %c0_15] : memref<128x128xf32, #tpu.memory_space<vmem>>, vector<128x128xf32>
      tpu.vector_store %arg6[%c0_14, %c0_15], %31 {strides = array<i32>} : memref<128x128xf32, #tpu.memory_space<vmem>>, vector<128x128xf32>,
      %cst_16 = arith.constant 0.000000e+00 : f32
      %33 = vector.broadcast %cst_16 : f32 to vector<128x1xf32>
      %c0_17 = arith.constant 0 : index
      %c0_18 = arith.constant 0 : index
      %34 = vector.load %arg7[%c0_17, %c0_18] : memref<128x1xf32, #tpu.memory_space<vmem>>, vector<128x1xf32>
      tpu.vector_store %arg7[%c0_17, %c0_18], %33 {strides = array<i32>} : memref<128x1xf32, #tpu.memory_space<vmem>>, vector<128x1xf32>,
    } else {
    }
    %c0 = arith.constant 0 : index
    %c0_1 = arith.constant 0 : index
    %3 = vector.load %arg4[%c0, %c0_1] : memref<128x128xf32, #tpu.memory_space<vmem>>, vector<128x128xf32>
    %c0_2 = arith.constant 0 : index
    %c0_3 = arith.constant 0 : index
    %4 = vector.load %arg2[%c0_2, %c0_3] : memref<128x2xi32, #tpu.memory_space<vmem>>, vector<128x2xi32>
    %5 = vector.extract_strided_slice %4 {offsets = [0, 0], sizes = [128, 1], strides = [1, 1]} : vector<128x2xi32> to vector<128x1xi32>
    %6 = vector.extract_strided_slice %4 {offsets = [0, 1], sizes = [128, 1], strides = [1, 1]} : vector<128x2xi32> to vector<128x1xi32>
    %c0_4 = arith.constant 0 : index
    %c0_5 = arith.constant 0 : index
    %7 = vector.load %arg3[%c0_4, %c0_5] : memref<1x128xi32, #tpu.memory_space<vmem>>, vector<1x128xi32>
    %8 = tpu.iota {dimensions = array<i32: 1>} : vector<128x128xi32>
    %9 = vector.broadcast %5 : vector<128x1xi32> to vector<128x128xi32>
    %10 = arith.cmpi eq, %8, %9 : vector<128x128xi32>
    %11 = arith.extui %10 : vector<128x128xi1> to vector<128x128xi32>
    %12 = arith.sitofp %11 : vector<128x128xi32> to vector<128x128xf32>
    %13 = vector.broadcast %6 : vector<128x1xi32> to vector<128x128xi32>
    %14 = arith.cmpi eq, %8, %13 : vector<128x128xi32>
    %15 = arith.extui %14 : vector<128x128xi1> to vector<128x128xi32>
    %16 = arith.sitofp %15 : vector<128x128xi32> to vector<128x128xf32>
    %17 = arith.addf %12, %16 : vector<128x128xf32>
    %cst = arith.constant dense<0.000000e+00> : vector<128x128xf32>
    %18 = tpu.matmul %17, %3, %cst {dimension_numbers = #tpu.dot_dimension_numbers<[1], [0], [0], [1], [0, 0, 1, 1], [], []>} : vector<128x128xf32>, vector<128x128xf32>, vector<128x128xf32> -> vector<128x128xf32>
    %19 = tpu.iota {dimensions = array<i32: 0>} : vector<128x128xi32>
    %20 = vector.broadcast %7 : vector<1x128xi32> to vector<128x128xi32>
    %21 = arith.cmpi eq, %19, %20 : vector<128x128xi32>
    %22 = arith.extui %21 : vector<128x128xi1> to vector<128x128xi32>
    %23 = arith.sitofp %22 : vector<128x128xi32> to vector<128x128xf32>
    %c0_6 = arith.constant 0 : index
    %c0_7 = arith.constant 0 : index
    %24 = vector.load %arg6[%c0_6, %c0_7] : memref<128x128xf32, #tpu.memory_space<vmem>>, vector<128x128xf32>
    %cst_8 = arith.constant dense<0.000000e+00> : vector<128x128xf32>
    %25 = tpu.matmul %23, %18, %cst_8 {dimension_numbers = #tpu.dot_dimension_numbers<[1], [0], [0], [1], [0, 0, 1, 1], [], []>} : vector<128x128xf32>, vector<128x128xf32>, vector<128x128xf32> -> vector<128x128xf32>
    %26 = arith.addf %24, %25 : vector<128x128xf32>
    %c0_9 = arith.constant 0 : index
    %c0_10 = arith.constant 0 : index
    %27 = vector.load %arg6[%c0_9, %c0_10] : memref<128x128xf32, #tpu.memory_space<vmem>>, vector<128x128xf32>
    tpu.vector_store %arg6[%c0_9, %c0_10], %26 {strides = array<i32>} : memref<128x128xf32, #tpu.memory_space<vmem>>, vector<128x128xf32>,
    %c0_i32_11 = arith.constant 0 : i32
    %28 = arith.cmpi eq, %arg1, %c0_i32_11 : i32
    %29 = arith.extui %28 : i1 to i32
    %c0_i32_12 = arith.constant 0 : i32
    %30 = arith.cmpi ne, %29, %c0_i32_12 : i32
    scf.if %30 {
      %c0_13 = arith.constant 0 : index
      %c0_14 = arith.constant 0 : index
      %31 = vector.load %arg6[%c0_13, %c0_14] : memref<128x128xf32, #tpu.memory_space<vmem>>, vector<128x128xf32>
      %32 = arith.addf %31, %3 : vector<128x128xf32>
      %c0_15 = arith.constant 0 : index
      %c0_16 = arith.constant 0 : index
      %33 = vector.load %arg5[%c0_15, %c0_16] : memref<128x128xf32, #tpu.memory_space<vmem>>, vector<128x128xf32>
      tpu.vector_store %arg5[%c0_15, %c0_16], %32 {strides = array<i32>} : memref<128x128xf32, #tpu.memory_space<vmem>>, vector<128x128xf32>,
    } else {
    }
    return
  }
  func.func @transform_0(%arg0: i32, %arg1: i32) -> (i32, i32) {
    %c0_i32 = arith.constant 0 : i32
    %c0_i32_0 = arith.constant 0 : i32
    return %arg1, %c0_i32 : i32, i32
  }
  func.func @transform_1(%arg0: i32, %arg1: i32) -> (i32, i32) {
    %c0_i32 = arith.constant 0 : i32
    %c0_i32_0 = arith.constant 0 : i32
    return %c0_i32, %arg1 : i32, i32
  }
  func.func @transform_2(%arg0: i32, %arg1: i32) -> (i32, i32) {
    %c0_i32 = arith.constant 0 : i32
    %c0_i32_0 = arith.constant 0 : i32
    return %c0_i32, %arg0 : i32, i32
  }
  func.func @transform_3(%arg0: i32, %arg1: i32) -> (i32, i32) {
    %c0_i32 = arith.constant 0 : i32
    %c0_i32_0 = arith.constant 0 : i32
    return %c0_i32, %arg0 : i32, i32
  }
}

</mosaic_0001>

<bundles_post_ra>
// kernel: tpu_custom_call.1
= control target key start
LH: loop header
LB: loop body
LE: loop exit
PB: predicated region body
PF: predicated region fallthrough
CT: control target
= control target key end

     0   :  { %v1044_v2 = vmov 0   ;;  %v1045_v4 = vmov 1   ;;  %s1445_s0 = inlined_call_operand.vmem [shape: s32[128,2], index: 0, kind: input, shape index: {}]   ;;  %s1446_s1 = inlined_call_operand.vmem [shape: s32[1,128], index: 1, kind: input, shape index: {}]   ;;  %s1447_s2 = inlined_call_operand.vmem [shape: f32[128,128], index: 2, kind: input, shape index: {}]   ;;  %s1448_s3 = inlined_call_operand.hbm [shape: f32[128,128], index: 3, kind: output, shape index: {}]  }
   0x1   :  { %v69_v0 = vld [vmem:[%s1445_s0 + $0x8] sm:$0xff]  ;;  %v68_v1 = vld [vmem:[%s1445_s0] sm:$0xff]  ;;  %1019 = vset.pattern.permute.xlu1 %v1044_v2  ;;  %1017 = vset.pattern.permute.xlu0 %v1044_v2  ;;  %v1080_v3 = vld [vmem:[%s1447_s2 + $0x78] sm:$0xff] }
   0x2   :  { %91 = vperm.xlu1 %1019, %v69_v0   ;;  %88 = vperm.xlu0 %1017, %v68_v1   ;;  %v1085_v5 = vld [vmem:[%s1447_s2 + $0x70] sm:$0xff]  ;;  %v1096_v7 = vld [vmem:[%s1447_s2 + $0x68] sm:$0xff] }
   0x3   :  { %v70_v6 = vld [vmem:[%s1445_s0 + $0x10] sm:$0xff]  ;;  %898 = vmatprep.subr.mxu0 %v1080_v3 }
   0x4   :  { %899 = vmatpush3.msra.mxu0 %v1080_v3 }
   0x5   :  { %900 = vmatprep.subr.mxu0 %v1085_v5 }
   0x6   :  { %1020 = vset.pattern.permute.xlu1 %v1045_v4  ;;  %1018 = vset.pattern.permute.xlu0 %v1045_v4 }
   0x7   :  { %187 = vperm.xlu1 %1020, %v69_v0   ;;  %184 = vperm.xlu0 %1018, %v68_v1  }
   0x8   :  { %8 = vsyncpa [#allocation5], 0  ;;  %v71_v8 = vld [vmem:[%s1445_s0 + $0x18] sm:$0xff]  ;;  %901 = vmatpush3.msra.mxu0 %v1085_v5  ;;  %v1105_v9 = vld [vmem:[%s1447_s2 + $0x60] sm:$0xff]  ;;  %v85_v34 = vlaneseq  ;;  %v1046_v40 = vmov 0.0  }
   0x9   :  { %902 = vmatprep.subr.mxu0 %v1096_v7  ;;  %v1112_v10 = vld [vmem:[%s1447_s2 + $0x58] sm:$0xff]  ;;  %v72_v11 = vld [vmem:[%s1445_s0 + $0x20] sm:$0xff]  ;;  %v1122_v12 = vld [vmem:[%s1447_s2 + $0x50] sm:$0xff] }
   0xa   :  { %903 = vmatpush3.msra.mxu0 %v1096_v7  ;;  %v1129_v13 = vld [vmem:[%s1447_s2 + $0x48] sm:$0xff]  ;;  %v1139_v15 = vld [vmem:[%s1447_s2 + $0x40] sm:$0xff]  ;;  %v1146_v16 = vld [vmem:[%s1447_s2 + $0x38] sm:$0xff]  ;;  %v1232_v35 = vand.u32 127, %v85_v34 }
   0xb   :  { %1021 = vset.pattern.permute.xlu1 %v1044_v2  ;;  %190 = vperm.xlu0 %1018, %v70_v6   ;;  %v73_v14 = vld [vmem:[%s1445_s0 + $0x28] sm:$0xff]  ;;  %v74_v17 = vld [vmem:[%s1445_s0 + $0x30] sm:$0xff]  ;;  %v75_v20 = vld [vmem:[%s1445_s0 + $0x38] sm:$0xff] }
   0xc   :  { %94 = vperm.xlu1 %1021, %v70_v6   ;;  %904 = vmatprep.subr.mxu0 %v1105_v9  ;;  %v1156_v18 = vld [vmem:[%s1447_s2 + $0x30] sm:$0xff]  ;;  %v1163_v19 = vld [vmem:[%s1447_s2 + $0x28] sm:$0xff]  ;;  %v1173_v21 = vld [vmem:[%s1447_s2 + $0x20] sm:$0xff] }
   0xd   :  { %905 = vmatpush3.msra.mxu0 %v1105_v9  ;;  %v1180_v22 = vld [vmem:[%s1447_s2 + $0x18] sm:$0xff]  ;;  %v76_v23 = vld [vmem:[%s1445_s0 + $0x40] sm:$0xff]  ;;  %v1190_v24 = vld [vmem:[%s1447_s2 + $0x10] sm:$0xff] }
   0xe   :  { %906 = vmatprep.subr.mxu0 %v1112_v10  ;;  %v1197_v25 = vld [vmem:[%s1447_s2 + $0x8] sm:$0xff]  ;;  %v1207_v27 = vld [vmem:[%s1447_s2] sm:$0xff]  ;;  %v78_v28 = vld [vmem:[%s1445_s0 + $0x50] sm:$0xff] }
   0xf   :  { %193 = vperm.xlu0 %1018, %v71_v8   ;;  %907 = vmatpush3.msra.mxu0 %v1112_v10  ;;  %v77_v26 = vld [vmem:[%s1445_s0 + $0x48] sm:$0xff]  ;;  %v79_v29 = vld [vmem:[%s1445_s0 + $0x58] sm:$0xff]  ;;  %v80_v30 = vld [vmem:[%s1445_s0 + $0x60] sm:$0xff] }
  0x10   :  { %97 = vperm.xlu1 %1021, %v71_v8   ;;  %908 = vmatprep.subr.mxu0 %v1122_v12  ;;  %v81_v31 = vld [vmem:[%s1445_s0 + $0x68] sm:$0xff]  ;;  %v82_v32 = vld [vmem:[%s1445_s0 + $0x70] sm:$0xff]  ;;  %v83_v33 = vld [vmem:[%s1445_s0 + $0x78] sm:$0xff] }
  0x11   :  { %909 = vmatpush3.msra.mxu0 %v1122_v12 }
  0x12   :  { %910 = vmatprep.subr.mxu0 %v1129_v13 }
  0x13   :  { %196 = vperm.xlu0 %1018, %v72_v11   ;;  %911 = vmatpush3.msra.mxu0 %v1129_v13 }
  0x14   :  { %100 = vperm.xlu1 %1021, %v72_v11   ;;  %912 = vmatprep.subr.mxu0 %v1139_v15 }
  0x15   :  { %913 = vmatpush3.msra.mxu0 %v1139_v15 }
  0x16   :  { %914 = vmatprep.subr.mxu0 %v1146_v16 }
  0x17   :  { %199 = vperm.xlu0 %1018, %v73_v14   ;;  %915 = vmatpush3.msra.mxu0 %v1146_v16 }
  0x18   :  { %103 = vperm.xlu1 %1021, %v73_v14   ;;  %916 = vmatprep.subr.mxu0 %v1156_v18 }
  0x19   :  { %917 = vmatpush3.msra.mxu0 %v1156_v18 }
  0x1a   :  { %918 = vmatprep.subr.mxu0 %v1163_v19 }
  0x1b   :  { %202 = vperm.xlu0 %1018, %v74_v17   ;;  %919 = vmatpush3.msra.mxu0 %v1163_v19 }
  0x1c   :  { %106 = vperm.xlu1 %1021, %v74_v17   ;;  %920 = vmatprep.subr.mxu0 %v1173_v21 }
  0x1d   :  { %921 = vmatpush3.msra.mxu0 %v1173_v21 }
  0x1e   :  { %922 = vmatprep.subr.mxu0 %v1180_v22 }
  0x1f   :  { %205 = vperm.xlu0 %1018, %v75_v20   ;;  %923 = vmatpush3.msra.mxu0 %v1180_v22 }
  0x20   :  { %109 = vperm.xlu1 %1021, %v75_v20   ;;  %924 = vmatprep.subr.mxu0 %v1190_v24 }
  0x21   :  { %925 = vmatpush3.msra.mxu0 %v1190_v24 }
  0x22   :  { %926 = vmatprep.subr.mxu0 %v1197_v25 }
  0x23   :  { %208 = vperm.xlu0 %1018, %v76_v23   ;;  %927 = vmatpush3.msra.mxu0 %v1197_v25 }
  0x24   :  { %112 = vperm.xlu1 %1021, %v76_v23   ;;  %928 = vmatprep.subr.mxu0 %v1207_v27 }
  0x25   :  { %929 = vmatpush3.msra.mxu0 %v1207_v27 }
  0x27   :  { %211 = vperm.xlu0 %1018, %v77_v26  }
  0x28   :  { %115 = vperm.xlu1 %1021, %v77_v26  }
  0x2b   :  { %214 = vperm.xlu0 %1018, %v78_v28  }
  0x2c   :  { %118 = vperm.xlu1 %1021, %v78_v28  }
  0x2f   :  { %217 = vperm.xlu0 %1018, %v79_v29  }
  0x30   :  { %121 = vperm.xlu1 %1021, %v79_v29  }
  0x33   :  { %220 = vperm.xlu0 %1018, %v80_v30  }
  0x34   :  { %124 = vperm.xlu1 %1021, %v80_v30  }
  0x37   :  { %223 = vperm.xlu0 %1018, %v81_v31  }
  0x38   :  { %127 = vperm.xlu1 %1021, %v81_v31  }
  0x3b   :  { %226 = vperm.xlu0 %1018, %v82_v32  }
  0x3c   :  { %130 = vperm.xlu1 %1021, %v82_v32  }
  0x3f   :  { %229 = vperm.xlu0 %1018, %v83_v33  }
  0x40   :  { %133 = vperm.xlu1 %1021, %v83_v33  }
  0x7d   :  { %v92_v36 = vpop.permute.xlu1 %91  ;;  %v89_v37 = vpop.permute.xlu0 %88 }
  0x7e   :  { %vm136_vm0 = vcmp.eq.s32.totalorder %v1232_v35, %v92_v36  ;;  %vm135_vm1 = vcmp.eq.s32.totalorder %v1232_v35, %v89_v37 }
  0x7f   :  { %v770_v41 = vsel %vm136_vm0, 1.0, %v1046_v40  ;;  %v769_v43 = vsel %vm135_vm1, 1.0, %v1046_v40 }
  0x82   :  { %v188_v38 = vpop.permute.xlu1 %187  ;;  %v185_v39 = vpop.permute.xlu0 %184 }
  0x83   :  { %vm232_vm2 = vcmp.eq.s32.totalorder %v1232_v35, %v188_v38  ;;  %vm231_vm3 = vcmp.eq.s32.totalorder %v1232_v35, %v185_v39 }
  0x84   :  { %v786_v42 = vsel %vm232_vm2, 1.0, %v1046_v40  ;;  %v785_v44 = vsel %vm231_vm3, 1.0, %v1046_v40 }
  0x85   :  { %v280_v45 = vadd.f32 %v786_v42, %v770_v41  ;;  %v279_v46 = vadd.f32 %v785_v44, %v769_v43 }
  0x86   :  { %v191_v47 = vpop.permute.xlu0 %190 }
  0x87   :  { %vm233_vm4 = vcmp.eq.s32.totalorder %v1232_v35, %v191_v47  ;;  %v95_v48 = vpop.permute.xlu1 %94  ;;  %930 = vmatprep.mubr.f32.mxu0 %v279_v46 }
  0x88   :  { %v787_v49 = vsel %vm233_vm4, 1.0, %v1046_v40  ;;  %vm137_vm5 = vcmp.eq.s32.totalorder %v1232_v35, %v95_v48  ;;  %931 = vmatmul.mubr.f32.vlgmr.msra.gmra.mxu0 %v280_v45 }
  0x89   :  { %v771_v50 = vsel %vm137_vm5, 1.0, %v1046_v40 }
  0x8a   :  { %v281_v51 = vadd.f32 %v787_v49, %v771_v50  ;;  %v194_v52 = vpop.permute.xlu0 %193 }
  0x8b   :  { %vm234_vm6 = vcmp.eq.s32.totalorder %v1232_v35, %v194_v52  ;;  %v98_v53 = vpop.permute.xlu1 %97 }
  0x8c   :  { %v788_v54 = vsel %vm234_vm6, 1.0, %v1046_v40  ;;  %vm138_vm7 = vcmp.eq.s32.totalorder %v1232_v35, %v98_v53  ;;  %933 = vmatprep.mubr.f32.mxu0 %v281_v51 }
  0x8d   :  { %v772_v55 = vsel %vm138_vm7, 1.0, %v1046_v40 }
  0x8e   :  { %v282_v56 = vadd.f32 %v788_v54, %v772_v55  ;;  %v197_v57 = vpop.permute.xlu0 %196 }
  0x8f   :  { %vm235_vm8 = vcmp.eq.s32.totalorder %v1232_v35, %v197_v57  ;;  %v101_v58 = vpop.permute.xlu1 %100 }
  0x90   :  { %v789_v59 = vsel %vm235_vm8, 1.0, %v1046_v40  ;;  %vm139_vm9 = vcmp.eq.s32.totalorder %v1232_v35, %v101_v58  ;;  %934 = vmatmul.mubr.f32.gmra.mxu0 %v282_v56 }
  0x91   :  { %v773_v60 = vsel %vm139_vm9, 1.0, %v1046_v40 }
  0x92   :  { %v283_v61 = vadd.f32 %v789_v59, %v773_v60  ;;  %v200_v62 = vpop.permute.xlu0 %199 }
  0x93   :  { %vm236_vm10 = vcmp.eq.s32.totalorder %v1232_v35, %v200_v62  ;;  %v104_v63 = vpop.permute.xlu1 %103 }
  0x94   :  { %v790_v0 = vsel %vm236_vm10, 1.0, %v1046_v40  ;;  %vm140_vm11 = vcmp.eq.s32.totalorder %v1232_v35, %v104_v63  ;;  %936 = vmatprep.mubr.f32.mxu0 %v283_v61 }
  0x95   :  { %v774_v1 = vsel %vm140_vm11, 1.0, %v1046_v40 }
  0x96   :  { %v284_v2 = vadd.f32 %v790_v0, %v774_v1  ;;  %v203_v4 = vpop.permute.xlu0 %202 }
  0x97   :  { %vm237_vm12 = vcmp.eq.s32.totalorder %v1232_v35, %v203_v4  ;;  %v107_v6 = vpop.permute.xlu1 %106 }
  0x98   :  { %v791_v8 = vsel %vm237_vm12, 1.0, %v1046_v40  ;;  %vm141_vm13 = vcmp.eq.s32.totalorder %v1232_v35, %v107_v6  ;;  %937 = vmatmul.mubr.f32.gmra.mxu0 %v284_v2 }
  0x99   :  { %v775_v11 = vsel %vm141_vm13, 1.0, %v1046_v40 }
  0x9a   :  { %v285_v14 = vadd.f32 %v791_v8, %v775_v11  ;;  %v206_v17 = vpop.permute.xlu0 %205 }
  0x9b   :  { %vm238_vm14 = vcmp.eq.s32.totalorder %v1232_v35, %v206_v17  ;;  %v110_v20 = vpop.permute.xlu1 %109  ;;  %v441_v17 = vshrl.u32 %v85_v34, 7 }
  0x9c   :  { %v792_v23 = vsel %vm238_vm14, 1.0, %v1046_v40  ;;  %vm142_vm15 = vcmp.eq.s32.totalorder %v1232_v35, %v110_v20  ;;  %939 = vmatprep.mubr.f32.mxu0 %v285_v14  ;;  %v1302_v20 = vld [vmem:[%s1446_s1] ss:$0 sm:$0xff]  ;;  %s1048_s1 = smov [#allocation4]  }
  0x9d   :  { %v776_v26 = vsel %vm142_vm15, 1.0, %v1046_v40  ;;  %v1318_v34 = vadd.s32 32, %v441_v17  ;;  %s758_s22 = sshll.u32 %s1048_s1, 4  ;;  %s759_s22 = int_to_ptr.vmem [resolvable:$true] %s758_s22 }
  0x9e   :  { %v286_v28 = vadd.f32 %v792_v23, %v776_v26  ;;  %v209_v29 = vpop.permute.xlu0 %208  ;;  %v1304_v23 = vadd.s32 8, %v441_v17  ;;  %v1047_v26 = vmov 1.0   ;;  %s1022_s23 = scalar_lea.vmem %s759_s22, 2048  ;;  %p1027_p1 = scmp.lt.s32.totalorder %s759_s22, %s759_s22 }
  0x9f   :  { %vm239_vm0 = vcmp.eq.s32.totalorder %v1232_v35, %v209_v29  ;;  %v113_v30 = vpop.permute.xlu1 %112  ;;  %v1326_v29 = vadd.s32 48, %v441_v17  ;;  %p1023_p0 = scmp.ne.s32.totalorder %s759_s22, %s1022_s23  ;;  %p1028_p2 = scmp.lt.s32.totalorder %s1022_s23, %s1022_s23 }
  0xa0   :  { %v793_v31 = vsel %vm239_vm0, 1.0, %v1046_v40  ;;  %vm143_vm1 = vcmp.eq.s32.totalorder %v1232_v35, %v113_v30  ;;  %940 = vmatmul.mubr.f32.gmra.mxu0 %v286_v28  ;;  %vm461_vm0 = vcmp.eq.s32.totalorder %v441_v17, %v1302_v20  ;;  %v1320_v28 = vadd.s32 40, %v441_v17 }
  0xa1   :  { %v777_v32 = vsel %vm143_vm1, 1.0, %v1046_v40  ;;  %986 = vmatprep.mubr.msk.f32.mxu1 %vm461_vm0, %v1047_v26  ;;  %vm462_vm1 = vcmp.eq.s32.totalorder %v1304_v23, %v1302_v20  ;;  %v1328_v30 = vadd.s32 56, %v441_v17  ;;  %p1029_p3 = por %p1028_p2, %p1027_p1 }
  0xa2   :  { %v287_v33 = vadd.f32 %v793_v31, %v777_v32  ;;  %v212_v36 = vpop.permute.xlu0 %211  ;;  %v1334_v31 = vadd.s32 64, %v441_v17  ;;  %v1336_v32 = vadd.s32 72, %v441_v17 }
  0xa3   :  { %vm240_vm2 = vcmp.eq.s32.totalorder %v1232_v35, %v212_v36  ;;  %v116_v37 = vpop.permute.xlu1 %115  ;;  %v1344_v36 = vadd.s32 88, %v441_v17  ;;  %p1030_p4 = pnand %p1029_p3, %p1023_p0 }
  0xa4   :  { %v794_v38 = vsel %vm240_vm2, 1.0, %v1046_v40  ;;  %vm144_vm3 = vcmp.eq.s32.totalorder %v1232_v35, %v116_v37  ;;  %942 = vmatprep.mubr.f32.mxu0 %v287_v33  ;;  %v1342_v33 = vadd.s32 80, %v441_v17  ;;  %v1350_v37 = vadd.s32 96, %v441_v17 }
  0xa5   :  { %v778_v39 = vsel %vm144_vm3, 1.0, %v1046_v40 }
  0xa6   :  { %v288_v41 = vadd.f32 %v794_v38, %v778_v39  ;;  %v215_v42 = vpop.permute.xlu0 %214  ;;  %v1352_v38 = vadd.s32 104, %v441_v17  ;;  %v1358_v39 = vadd.s32 112, %v441_v17 }
  0xa7   :  { %vm241_vm4 = vcmp.eq.s32.totalorder %v1232_v35, %v215_v42  ;;  %v119_v43 = vpop.permute.xlu1 %118 }
  0xa8   :  { %v795_v44 = vsel %vm241_vm4, 1.0, %v1046_v40  ;;  %vm145_vm5 = vcmp.eq.s32.totalorder %v1232_v35, %v119_v43  ;;  %943 = vmatmul.mubr.f32.gmra.mxu0 %v288_v41  ;;  %vm465_vm4 = vcmp.eq.s32.totalorder %v1318_v34, %v1302_v20  ;;  %v1360_v41 = vadd.s32 120, %v441_v17 }
  0xa9   :  { %v779_v45 = vsel %vm145_vm5, 1.0, %v1046_v40  ;;  %vm466_vm5 = vcmp.eq.s32.totalorder %v1320_v28, %v1302_v20 }
  0xaa   :  { %v289_v46 = vadd.f32 %v795_v44, %v779_v45  ;;  %v218_v47 = vpop.permute.xlu0 %217 }
  0xab   :  { %vm242_vm6 = vcmp.eq.s32.totalorder %v1232_v35, %v218_v47  ;;  %v122_v48 = vpop.permute.xlu1 %121 }
  0xac   :  { %v796_v49 = vsel %vm242_vm6, 1.0, %v1046_v40  ;;  %vm146_vm7 = vcmp.eq.s32.totalorder %v1232_v35, %v122_v48  ;;  %945 = vmatprep.mubr.f32.mxu0 %v289_v46  ;;  %vm467_vm6 = vcmp.eq.s32.totalorder %v1326_v29, %v1302_v20 }
  0xad   :  { %v780_v50 = vsel %vm146_vm7, 1.0, %v1046_v40  ;;  %vm468_vm7 = vcmp.eq.s32.totalorder %v1328_v30, %v1302_v20 }
  0xae   :  { %v290_v51 = vadd.f32 %v796_v49, %v780_v50  ;;  %v221_v52 = vpop.permute.xlu0 %220 }
  0xaf   :  { %vm243_vm8 = vcmp.eq.s32.totalorder %v1232_v35, %v221_v52  ;;  %v125_v53 = vpop.permute.xlu1 %124 }
  0xb0   :  { %v797_v54 = vsel %vm243_vm8, 1.0, %v1046_v40  ;;  %vm147_vm9 = vcmp.eq.s32.totalorder %v1232_v35, %v125_v53  ;;  %946 = vmatmul.mubr.f32.gmra.mxu0 %v290_v51  ;;  %vm469_vm8 = vcmp.eq.s32.totalorder %v1334_v31, %v1302_v20 }
  0xb1   :  { %v781_v55 = vsel %vm147_vm9, 1.0, %v1046_v40  ;;  %vm470_vm9 = vcmp.eq.s32.totalorder %v1336_v32, %v1302_v20 }
  0xb2   :  { %v291_v56 = vadd.f32 %v797_v54, %v781_v55  ;;  %v224_v57 = vpop.permute.xlu0 %223 }
  0xb3   :  { %vm244_vm10 = vcmp.eq.s32.totalorder %v1232_v35, %v224_v57  ;;  %v128_v58 = vpop.permute.xlu1 %127 }
  0xb4   :  { %v798_v59 = vsel %vm244_vm10, 1.0, %v1046_v40  ;;  %vm148_vm11 = vcmp.eq.s32.totalorder %v1232_v35, %v128_v58  ;;  %948 = vmatprep.mubr.f32.mxu0 %v291_v56  ;;  %vm471_vm10 = vcmp.eq.s32.totalorder %v1342_v33, %v1302_v20 }
  0xb5   :  { %v782_v60 = vsel %vm148_vm11, 1.0, %v1046_v40  ;;  %vm472_vm11 = vcmp.eq.s32.totalorder %v1344_v36, %v1302_v20 }
  0xb6   :  { %v292_v61 = vadd.f32 %v798_v59, %v782_v60  ;;  %v227_v62 = vpop.permute.xlu0 %226 }
  0xb7   :  { %vm245_vm12 = vcmp.eq.s32.totalorder %v1232_v35, %v227_v62  ;;  %v131_v63 = vpop.permute.xlu1 %130 }
  0xb8   :  { %v799_v0 = vsel %vm245_vm12, 1.0, %v1046_v40  ;;  %vm149_vm13 = vcmp.eq.s32.totalorder %v1232_v35, %v131_v63  ;;  %949 = vmatmul.mubr.f32.gmra.mxu0 %v292_v61  ;;  %vm473_vm12 = vcmp.eq.s32.totalorder %v1350_v37, %v1302_v20 }
  0xb9   :  { %v783_v1 = vsel %vm149_vm13, 1.0, %v1046_v40  ;;  %vm474_vm13 = vcmp.eq.s32.totalorder %v1352_v38, %v1302_v20 }
  0xba   :  { %v293_v2 = vadd.f32 %v799_v0, %v783_v1  ;;  %v230_v4 = vpop.permute.xlu0 %229 }
  0xbb   :  { %vm246_vm14 = vcmp.eq.s32.totalorder %v1232_v35, %v230_v4  ;;  %v134_v6 = vpop.permute.xlu1 %133 }
  0xbc   :  { %v800_v8 = vsel %vm246_vm14, 1.0, %v1046_v40  ;;  %vm150_vm15 = vcmp.eq.s32.totalorder %v1232_v35, %v134_v6  ;;  %951 = vmatprep.mubr.f32.mxu0 %v293_v2  ;;  %v1310_v35 = vadd.s32 16, %v441_v17  ;;  %vm475_vm14 = vcmp.eq.s32.totalorder %v1358_v39, %v1302_v20 }
  0xbd   :  { %v784_v11 = vsel %vm150_vm15, 1.0, %v1046_v40  ;;  %v1312_v40 = vadd.s32 24, %v441_v17  ;;  %vm476_vm15 = vcmp.eq.s32.totalorder %v1360_v41, %v1302_v20 }
  0xbe   :  { %v294_v14 = vadd.f32 %v800_v8, %v784_v11  ;;  %vm463_vm2 = vcmp.eq.s32.totalorder %v1310_v35, %v1302_v20 }
  0xbf   :  { %vm464_vm3 = vcmp.eq.s32.totalorder %v1312_v40, %v1302_v20 }
  0xc0   :  { %952 = vmatmul.mubr.f32.gmra.mxu0 %v294_v14 }
 0x148   :  { %v932_v42 = vpop.f32.mrf.mxu0 }
 0x14a   :  { %v361_v43 = vpop.f32.mrf.mxu0 }
 0x150   :  { %v935_v44 = vpop.f32.mrf.mxu0 }
 0x152   :  { %v371_v45 = vpop.f32.mrf.mxu0 }
 0x158   :  { %v938_v46 = vpop.f32.mrf.mxu0 }
 0x15a   :  { %v381_v47 = vpop.f32.mrf.mxu0 }
 0x160   :  { %v941_v48 = vpop.f32.mrf.mxu0 }
 0x162   :  { %v391_v49 = vpop.f32.mrf.mxu0 }
 0x168   :  { %v944_v50 = vpop.f32.mrf.mxu0 }
 0x16a   :  { %v401_v51 = vpop.f32.mrf.mxu0 }
 0x170   :  { %v947_v52 = vpop.f32.mrf.mxu0 }
 0x172   :  { %v411_v53 = vpop.f32.mrf.mxu0 }
 0x178   :  { %v950_v54 = vpop.f32.mrf.mxu0 }
 0x17a   :  { %v421_v55 = vpop.f32.mrf.mxu0 }
 0x180   :  { %v953_v56 = vpop.f32.mrf.mxu0 }
 0x181   :  { %954 = vmatprep.subr.mxu1 %v953_v56 }
 0x182   :  { %v431_v57 = vpop.f32.mrf.mxu0  ;;  %955 = vmatpush3.msra.mxu1 %v953_v56 }
 0x183   :  { %956 = vmatprep.subr.mxu1 %v431_v57 }
 0x184   :  { %957 = vmatpush3.msra.mxu1 %v431_v57 }
 0x185   :  { %958 = vmatprep.subr.mxu1 %v950_v54 }
 0x186   :  { %959 = vmatpush3.msra.mxu1 %v950_v54 }
 0x187   :  { %960 = vmatprep.subr.mxu1 %v421_v55 }
 0x188   :  { %961 = vmatpush3.msra.mxu1 %v421_v55 }
 0x189   :  { %962 = vmatprep.subr.mxu1 %v947_v52 }
 0x18a   :  { %963 = vmatpush3.msra.mxu1 %v947_v52 }
 0x18b   :  { %964 = vmatprep.subr.mxu1 %v411_v53 }
 0x18c   :  { %965 = vmatpush3.msra.mxu1 %v411_v53 }
 0x18d   :  { %966 = vmatprep.subr.mxu1 %v944_v50 }
 0x18e   :  { %967 = vmatpush3.msra.mxu1 %v944_v50 }
 0x18f   :  { %968 = vmatprep.subr.mxu1 %v401_v51 }
 0x190   :  { %969 = vmatpush3.msra.mxu1 %v401_v51 }
 0x191   :  { %970 = vmatprep.subr.mxu1 %v941_v48 }
 0x192   :  { %971 = vmatpush3.msra.mxu1 %v941_v48 }
 0x193   :  { %972 = vmatprep.subr.mxu1 %v391_v49 }
 0x194   :  { %973 = vmatpush3.msra.mxu1 %v391_v49 }
 0x195   :  { %974 = vmatprep.subr.mxu1 %v938_v46 }
 0x196   :  { %975 = vmatpush3.msra.mxu1 %v938_v46 }
 0x197   :  { %976 = vmatprep.subr.mxu1 %v381_v47 }
 0x198   :  { %977 = vmatpush3.msra.mxu1 %v381_v47 }
 0x199   :  { %978 = vmatprep.subr.mxu1 %v935_v44 }
 0x19a   :  { %979 = vmatpush3.msra.mxu1 %v935_v44 }
 0x19b   :  { %980 = vmatprep.subr.mxu1 %v371_v45 }
 0x19c   :  { %981 = vmatpush3.msra.mxu1 %v371_v45 }
 0x19d   :  { %982 = vmatprep.subr.mxu1 %v932_v42 }
 0x19e   :  { %983 = vmatpush3.msra.mxu1 %v932_v42 }
 0x19f   :  { %984 = vmatprep.subr.mxu1 %v361_v43 }
 0x1a0   :  { %985 = vmatpush3.msra.mxu1 %v361_v43 }
 0x1a1   :  { %987 = vmatmul.mubr.msk.f32.vlgmr.msra.gmra.mxu1 %vm462_vm1, %v1047_v26 }
 0x1a2   :  { %989 = vmatprep.mubr.msk.f32.mxu1 %vm463_vm2, %v1047_v26 }
 0x1a5   :  { %990 = vmatmul.mubr.msk.f32.gmra.mxu1 %vm464_vm3, %v1047_v26 }
 0x1a6   :  { %992 = vmatprep.mubr.msk.f32.mxu1 %vm465_vm4, %v1047_v26 }
 0x1a9   :  { %993 = vmatmul.mubr.msk.f32.gmra.mxu1 %vm466_vm5, %v1047_v26 }
 0x1aa   :  { %995 = vmatprep.mubr.msk.f32.mxu1 %vm467_vm6, %v1047_v26 }
 0x1ad   :  { %996 = vmatmul.mubr.msk.f32.gmra.mxu1 %vm468_vm7, %v1047_v26 }
 0x1ae   :  { %998 = vmatprep.mubr.msk.f32.mxu1 %vm469_vm8, %v1047_v26 }
 0x1b1   :  { %999 = vmatmul.mubr.msk.f32.gmra.mxu1 %vm470_vm9, %v1047_v26 }
 0x1b2   :  { %1001 = vmatprep.mubr.msk.f32.mxu1 %vm471_vm10, %v1047_v26 }
 0x1b5   :  { %1002 = vmatmul.mubr.msk.f32.gmra.mxu1 %vm472_vm11, %v1047_v26 }
 0x1b6   :  { %1004 = vmatprep.mubr.msk.f32.mxu1 %vm473_vm12, %v1047_v26 }
 0x1b9   :  { %1005 = vmatmul.mubr.msk.f32.gmra.mxu1 %vm474_vm13, %v1047_v26 }
 0x1ba   :  { %1007 = vmatprep.mubr.msk.f32.mxu1 %vm475_vm14, %v1047_v26 }
 0x1bd   :  { %1008 = vmatmul.mubr.msk.f32.gmra.mxu1 %vm476_vm15, %v1047_v26 }
 0x261   :  { %v988_v58 = vpop.f32.mrf.mxu1 }
 0x262   :  { %v722_v59 = vadd.f32 %v988_v58, %v1197_v25 }
 0x263   :  { %v591_v60 = vpop.f32.mrf.mxu1 }
 0x264   :  { %738 = vst [vmem:[#allocation4 + $0x8] sm:$0xff] %v722_v59  ;;  %v721_v61 = vadd.f32 %v591_v60, %v1207_v27 }
 0x265   :  { %v991_v62 = vpop.f32.mrf.mxu1 }
 0x266   :  { %737 = vst [vmem:[#allocation4] sm:$0xff] %v721_v61  ;;  %v724_v63 = vadd.f32 %v991_v62, %v1180_v22 }
 0x267   :  { %v601_v0 = vpop.f32.mrf.mxu1 }
 0x268   :  { %740 = vst [vmem:[#allocation4 + $0x18] sm:$0xff] %v724_v63  ;;  %v723_v1 = vadd.f32 %v601_v0, %v1190_v24 }
 0x269   :  { %v994_v2 = vpop.f32.mrf.mxu1 }
 0x26a   :  { %739 = vst [vmem:[#allocation4 + $0x10] sm:$0xff] %v723_v1  ;;  %v726_v4 = vadd.f32 %v994_v2, %v1163_v19 }
 0x26b   :  { %v611_v6 = vpop.f32.mrf.mxu1 }
 0x26c   :  { %742 = vst [vmem:[#allocation4 + $0x28] sm:$0xff] %v726_v4  ;;  %v725_v25 = vadd.f32 %v611_v6, %v1173_v21 }
 0x26d   :  { %v997_v8 = vpop.f32.mrf.mxu1 }
 0x26e   :  { %741 = vst [vmem:[#allocation4 + $0x20] sm:$0xff] %v725_v25  ;;  %v728_v27 = vadd.f32 %v997_v8, %v1146_v16 }
 0x26f   :  { %v621_v11 = vpop.f32.mrf.mxu1 }
 0x270   :  { %744 = vst [vmem:[#allocation4 + $0x38] sm:$0xff] %v728_v27  ;;  %v727_v22 = vadd.f32 %v621_v11, %v1156_v18 }
 0x271   :  { %v1000_v14 = vpop.f32.mrf.mxu1 }
 0x272   :  { %743 = vst [vmem:[#allocation4 + $0x30] sm:$0xff] %v727_v22  ;;  %v730_v24 = vadd.f32 %v1000_v14, %v1129_v13 }
 0x273   :  { %v631_v17 = vpop.f32.mrf.mxu1 }
 0x274   :  { %746 = vst [vmem:[#allocation4 + $0x48] sm:$0xff] %v730_v24  ;;  %v729_v19 = vadd.f32 %v631_v17, %v1139_v15 }
 0x275   :  { %v1003_v20 = vpop.f32.mrf.mxu1 }
 0x276   :  { %745 = vst [vmem:[#allocation4 + $0x40] sm:$0xff] %v729_v19  ;;  %v732_v21 = vadd.f32 %v1003_v20, %v1112_v10 }
 0x277   :  { %v641_v23 = vpop.f32.mrf.mxu1 }
 0x278   :  { %748 = vst [vmem:[#allocation4 + $0x58] sm:$0xff] %v732_v21  ;;  %v731_v16 = vadd.f32 %v641_v23, %v1122_v12 }
 0x279   :  { %v1006_v26 = vpop.f32.mrf.mxu1 }
 0x27a   :  { %747 = vst [vmem:[#allocation4 + $0x50] sm:$0xff] %v731_v16  ;;  %v734_v18 = vadd.f32 %v1006_v26, %v1096_v7 }
 0x27b   :  { %v651_v35 = vpop.f32.mrf.mxu1 }
 0x27c   :  { %750 = vst [vmem:[#allocation4 + $0x68] sm:$0xff] %v734_v18  ;;  %v733_v13 = vadd.f32 %v651_v35, %v1105_v9 }
 0x27d   :  { %v1009_v40 = vpop.f32.mrf.mxu1 }
 0x27e   :  { %749 = vst [vmem:[#allocation4 + $0x60] sm:$0xff] %v733_v13  ;;  %v736_v15 = vadd.f32 %v1009_v40, %v1080_v3 }
 0x27f   :  { %v661_v34 = vpop.f32.mrf.mxu1 }
 0x280   :  { %752 = vst [vmem:[#allocation4 + $0x78] sm:$0xff] %v736_v15  ;;  %v735_v10 = vadd.f32 %v661_v34, %v1085_v5 }
 0x282   :  { %751 = vst [vmem:[#allocation4 + $0x70] sm:$0xff] %v735_v10 }
 0x283   :  { %1033 = shalt.err (!%p1030_p4)
}
 0x284   :  { %s1049_s24 = smov 128   ;;  %s1050_s25 = smov 8  }
 0x285   :  { %764 = dma.vmem_to_hbm [thread:$0]  %s759_s22, 2048, %s1448_s3, [#allocation5], %s1049_s24, %s1049_s24, %s1050_s25  }
 0x286   :  { %1042 = dma.done.wait [#allocation5], 2048  }
 0x287   :  { %1043 = vsyncadd [#allocation5], 4294965248 }
 0x288   :  { %768 = vsyncpa [#allocation5], 1 }

</bundles_post_ra>
